<compile_context>
chip_gen: v7x
topology: tpu7x:2x2x1
jax: 0.10.0
libtpu: 0.0.40
codegen_flags: <defaults>
</compile_context>

<pallas_src>
import functools

import jax
import jax.numpy as jnp
from jax.experimental import pallas as pl
from jax.experimental.pallas import tpu as pltpu


def _round_up(x: int, m: int) -> int:
    return ((x + m - 1) // m) * m


# Conservative double-buffered VMEM budget that fits every generation's scoped
# default (v5e: 16 MiB, v6e/v7x: 32 MiB) with headroom for Mosaic internals.
_VMEM_BUDGET = 13 * 1024 * 1024


def _bmm_single_k_kernel(a_ref, f_ref, o_ref):
    # a_ref: (tm, K), f_ref: (K, tn), o_ref: (tm, tn).
    # Whole reduction in one MXU pass; accumulate in f32, cast once.
    o_ref[...] = jnp.dot(
        a_ref[...], f_ref[...], preferred_element_type=jnp.float32
    ).astype(o_ref.dtype)


def _bmm_ktiled_kernel(a_ref, f_ref, o_ref, acc_ref, *, k_total, tk, mask_k):
    # a_ref: (tm, tk), f_ref: (tk, tn), o_ref: (tm, tn), acc_ref: (tm, tn) f32.
    k = pl.program_id(3)

    @pl.when(k == 0)
    def _init():
        acc_ref[...] = jnp.zeros_like(acc_ref)

    a = a_ref[...]
    f = f_ref[...]
    if mask_k:
        # K isn't a multiple of tk: the last K tile reads past the true extent
        # and that garbage would feed *valid* output rows, so zero both
        # operands (one-sided masking could still let 0*NaN through).  The
        # iota/compare/select is all-true on non-last tiles and is negligible
        # VPU work on a bandwidth-bound kernel.
        kcol = jax.lax.broadcasted_iota(jnp.int32, a.shape, 1) + k * tk
        a = jnp.where(kcol < k_total, a, jnp.zeros_like(a))
        krow = jax.lax.broadcasted_iota(jnp.int32, f.shape, 0) + k * tk
        f = jnp.where(krow < k_total, f, jnp.zeros_like(f))

    acc_ref[...] += jnp.dot(a, f, preferred_element_type=jnp.float32)

    @pl.when(k == pl.num_programs(3) - 1)
    def _finalize():
        o_ref[...] = acc_ref[...].astype(o_ref.dtype)


def mean_aggregator(features: jax.Array, A: jax.Array, *,
                    tm: int = 512, tn: int = 512, tk: int = 1024,
                    compute_dtype=jnp.bfloat16,
                    vmem_budget_bytes: int = _VMEM_BUDGET) -> jax.Array:
    """x = bmm(A, features). A: (B, N, N), features: (B, N, D) -> (B, N, D)."""
    B, N, D = features.shape
    assert A.shape == (B, N, N), f"A must be (B, N, N), got {A.shape}"

    out_dtype = jnp.result_type(A.dtype, features.dtype)
    cdt = jnp.dtype(compute_dtype) if compute_dtype is not None else jnp.dtype(out_dtype)
    # In a real GNN this cast fuses into A's producer; on its own it is still a
    # net win whenever A is re-streamed or the caller already holds bf16.
    A_c = A.astype(cdt)
    F_c = features.astype(cdt)

    in_b = cdt.itemsize
    out_b = jnp.dtype(out_dtype).itemsize
    # Second-minor (sublane) tile granularity depends on the packed in-dtype.
    sub = {4: 8, 2: 16, 1: 32}.get(in_b, 8)

    # Minor block dims: multiples of 128 (a block larger than the dim is fine:
    # it becomes one partial block whose OOB region is never written back).
    # Second-minor block dims: multiples of `sub`.
    tn = min(tn, _round_up(D, 128))
    tm = min(tm, _round_up(N, sub))

    # Collapse the K (reduction) axis entirely when a (tm, N) stripe of A plus
    # an (N, tn) stripe of features fits the VMEM budget: fewest grid steps,
    # no accumulator scratch, no K-edge masking.
    collapsed_fp = 2 * (tm * N + N * tn) * in_b + 2 * tm * tn * out_b
    collapse_k = collapsed_fp <= vmem_budget_bytes

    if not collapse_k:
        tk = min(tk, _round_up(N, 128))

        def _fp():
            return (2 * (tm * tk + tk * tn) * in_b
                    + 2 * tm * tn * out_b + tm * tn * 4)

        # Safety net if a caller-supplied config overshoots the budget;
        # defaults (512/512/1024, <=11 MiB even in f32) never trigger this.
        while _fp() > vmem_budget_bytes and tn > 128:
            tn = max(128, _round_up(tn // 2, 128))
        while _fp() > vmem_budget_bytes and tk > 128:
            tk = max(128, _round_up(tk // 2, 128))
        while _fp() > vmem_budget_bytes and tm > sub:
            tm = max(sub, _round_up(tm // 2, sub))

    n_i = pl.cdiv(N, tm)
    n_j = pl.cdiv(D, tn)

    # Scheduler hint: A is re-streamed once per j tile, features once per i
    # tile, output written once.
    cost = pl.CostEstimate(
        flops=2 * B * N * N * D,
        transcendentals=0,
        bytes_accessed=int(B * N * N * in_b * n_j
                           + B * N * D * in_b * n_i
                           + B * N * D * out_b),
    )

    if collapse_k:
        grid = (B, n_i, n_j)
        return pl.pallas_call(
            _bmm_single_k_kernel,
            out_shape=jax.ShapeDtypeStruct((B, N, D), out_dtype),
            grid_spec=pltpu.PrefetchScalarGridSpec(
                num_scalar_prefetch=0,
                grid=grid,
                in_specs=[
                    # Batch dim squeezed (None) -> clean 2-D MXU tiles.
                    pl.BlockSpec((None, tm, N), lambda b, i, j: (b, i, 0)),
                    pl.BlockSpec((None, N, tn), lambda b, i, j: (b, 0, j)),
                ],
                out_specs=pl.BlockSpec((None, tm, tn), lambda b, i, j: (b, i, j)),
            ),
            compiler_params=pltpu.CompilerParams(
                dimension_semantics=("parallel", "parallel", "parallel"),
                vmem_limit_bytes=32 * 1024 * 1024,
            ),
            cost_estimate=cost,
        )(A_c, F_c)

    # K-tiled path with a resident f32 accumulator and masked K edge.
    n_k = pl.cdiv(N, tk)
    grid = (B, n_i, n_j, n_k)
    kernel = functools.partial(
        _bmm_ktiled_kernel, k_total=N, tk=tk, mask_k=(N % tk != 0))

    return pl.pallas_call(
        kernel,
        out_shape=jax.ShapeDtypeStruct((B, N, D), out_dtype),
        grid_spec=pltpu.PrefetchScalarGridSpec(
            num_scalar_prefetch=0,
            grid=grid,
            in_specs=[
                pl.BlockSpec((None, tm, tk), lambda b, i, j, k: (b, i, k)),
                pl.BlockSpec((None, tk, tn), lambda b, i, j, k: (b, k, j)),
            ],
            out_specs=pl.BlockSpec((None, tm, tn), lambda b, i, j, k: (b, i, j)),
            scratch_shapes=[pltpu.VMEM((tm, tn), jnp.float32)],
        ),
        compiler_params=pltpu.CompilerParams(
            # batch / row / col tiles parallel (megacore on v7x), reduction
            # axis last and "arbitrary" so the accumulator stays resident.
            dimension_semantics=("parallel", "parallel", "parallel", "arbitrary"),
            vmem_limit_bytes=32 * 1024 * 1024,
        ),
        cost_estimate=cost,
    )(A_c, F_c)


if __name__ == "__main__":
    key = jax.random.PRNGKey(0)
    k1, k2, k3, k4 = jax.random.split(key, 4)

    # --- Test 1: small shapes implied by the module (B=2, N=16, D=32) ------
    B, N, D = 2, 16, 32
    features = jax.random.normal(k1, (B, N, D), dtype=jnp.float32)
    A_raw = jax.random.uniform(k2, (B, N, N), dtype=jnp.float32)
    A = A_raw / jnp.sum(A_raw, axis=-1, keepdims=True)   # row-normalized adjacency

    out = jax.block_until_ready(mean_aggregator(features, A))
    ref = jnp.einsum("bij,bjd->bid", A, features)
    assert out.shape == (B, N, D) and out.dtype == ref.dtype
    # bf16 operands + f32 accumulation vs the fp32 reference.
    assert jnp.allclose(out, ref, atol=5e-3, rtol=5e-2), "mismatch vs reference (small)"

    # --- Test 2: non-tile-aligned shapes, collapsed-K (single MXU pass) ----
    B2, N2, D2 = 2, 600, 96
    features2 = jax.random.normal(k3, (B2, N2, D2), dtype=jnp.float32)
    A2_raw = jax.random.uniform(k4, (B2, N2, N2), dtype=jnp.float32)
    A2 = A2_raw / jnp.sum(A2_raw, axis=-1, keepdims=True)

    out2 = jax.block_until_ready(mean_aggregator(features2, A2))
    ref2 = jnp.einsum("bij,bjd->bid", A2, features2)
    assert out2.shape == (B2, N2, D2)
    assert jnp.allclose(out2, ref2, atol=5e-3, rtol=5e-2), "mismatch vs reference (collapsed-K)"

    # --- Test 3: force the K-tiled + masked-edge path on the same data -----
    out3 = jax.block_until_ready(
        mean_aggregator(features2, A2, vmem_budget_bytes=1 * 1024 * 1024))
    assert jnp.allclose(out3, ref2, atol=5e-3, rtol=5e-2), "mismatch vs reference (K-tiled)"
    # Both kernel paths should agree to f32-accumulation noise.
    assert jnp.allclose(out3, out2, atol=1e-4, rtol=1e-3), "collapsed vs K-tiled path mismatch"

    print("KERNEL_OK")
</pallas_src>

<mosaic_0001>
module attributes {stable_mosaic.version = 11 : i64} {
  func.func @_bmm_single_k_kernel(%arg0: i32, %arg1: i32, %arg2: i32, %arg3: memref<1x16x16xbf16, #tpu.memory_space<vmem>>, %arg4: memref<1x16x128xbf16, #tpu.memory_space<vmem>>, %arg5: memref<1x16x128xf32, #tpu.memory_space<vmem>>) attributes {dimension_semantics = [#tpu.dimension_semantics<parallel>, #tpu.dimension_semantics<parallel>, #tpu.dimension_semantics<parallel>], iteration_bounds = array<i64: 2, 1, 1>, scalar_prefetch = 0 : i64, scratch_operands = 0 : i64, tpu.core_type = #tpu.core_type<tc>, window_params = [{transform_indices = @transform_0, window_bounds = array<i64: 1, 16, 16>}, {transform_indices = @transform_1, window_bounds = array<i64: 1, 16, 128>}, {transform_indices = @transform_2, window_bounds = array<i64: 1, 16, 128>}]} {
    %c0 = arith.constant 0 : index
    %c0_0 = arith.constant 0 : index
    %c0_1 = arith.constant 0 : index
    %0 = vector.load %arg3[%c0, %c0_0, %c0_1] : memref<1x16x16xbf16, #tpu.memory_space<vmem>>, vector<1x16x16xbf16>
    %1 = vector.shape_cast %0 : vector<1x16x16xbf16> to vector<16x16xbf16>
    %c0_2 = arith.constant 0 : index
    %c0_3 = arith.constant 0 : index
    %c0_4 = arith.constant 0 : index
    %2 = vector.load %arg4[%c0_2, %c0_3, %c0_4] : memref<1x16x128xbf16, #tpu.memory_space<vmem>>, vector<1x16x128xbf16>
    %3 = vector.shape_cast %2 : vector<1x16x128xbf16> to vector<16x128xbf16>
    %cst = arith.constant dense<0.000000e+00> : vector<16x128xf32>
    %4 = tpu.matmul %1, %3, %cst {dimension_numbers = #tpu.dot_dimension_numbers<[1], [0], [0], [1], [0, 0, 1, 1], [], []>} : vector<16x16xbf16>, vector<16x128xbf16>, vector<16x128xf32> -> vector<16x128xf32>
    %c0_5 = arith.constant 0 : index
    %c0_6 = arith.constant 0 : index
    %c0_7 = arith.constant 0 : index
    %5 = vector.load %arg5[%c0_5, %c0_6, %c0_7] : memref<1x16x128xf32, #tpu.memory_space<vmem>>, vector<1x16x128xf32>
    %6 = vector.shape_cast %5 : vector<1x16x128xf32> to vector<16x128xf32>
    %7 = vector.shape_cast %4 : vector<16x128xf32> to vector<1x16x128xf32>
    tpu.vector_store %arg5[%c0_5, %c0_6, %c0_7], %7 {strides = array<i32>} : memref<1x16x128xf32, #tpu.memory_space<vmem>>, vector<1x16x128xf32>,
    return
  }
  func.func @transform_0(%arg0: i32, %arg1: i32, %arg2: i32) -> (i32, i32, i32) {
    %c0_i32 = arith.constant 0 : i32
    %c0_i32_0 = arith.constant 0 : i32
    return %arg0, %arg1, %c0_i32 : i32, i32, i32
  }
  func.func @transform_1(%arg0: i32, %arg1: i32, %arg2: i32) -> (i32, i32, i32) {
    %c0_i32 = arith.constant 0 : i32
    %c0_i32_0 = arith.constant 0 : i32
    return %arg0, %c0_i32, %arg2 : i32, i32, i32
  }
  func.func @transform_2(%arg0: i32, %arg1: i32, %arg2: i32) -> (i32, i32, i32) {
    %c0_i32 = arith.constant 0 : i32
    return %arg0, %arg1, %arg2 : i32, i32, i32
  }
}

</mosaic_0001>

<bundles_post_ra>
// kernel: tpu_custom_call.1
= control target key start
LH: loop header
LB: loop body
LE: loop exit
PB: predicated region body
PF: predicated region fallthrough
CT: control target
= control target key end

     0   :  { %7 = vsyncpa [#allocation3], 0  ;;  %s947_s0 = inlined_call_operand.hbm [shape: bf16[2,16,16], index: 0, kind: input, shape index: {}]   ;;  %s948_s1 = inlined_call_operand.hbm [shape: bf16[2,16,32], index: 1, kind: input, shape index: {}]   ;;  %s949_s2 = inlined_call_operand.hbm [shape: f32[2,16,32], index: 2, kind: output, shape index: {}]  }
   0x1   :  { %9 = vsyncpa [#allocation3 + $0x1], 0 }
   0x2   :  { %10 = vsyncpa [#allocation6], 0 }
   0x3   :  { %12 = vsyncpa [#allocation6 + $0x1], 0 }
   0x4   :  { %13 = vsyncpa [#allocation4], 0 }
   0x5   :  { %15 = vsyncpa [#allocation4 + $0x1], 0  ;;  %s710_s9 = smov 0   ;;  %s712_s10 = smov 0  }
   0x6   :  { %s714_s11 = smov 0   ;;  %s716_s12 = smov 0  }
   0x7   :  { %s718_s13 = smov 0   ;;  %s720_s14 = smov 0  }
   0x8 LB: > { %s430_s15 = sadd.s32 4294967295, %s684_s14   ;;  %s431_s16 = sadd.s32 4294967294, %s684_s14   ;;  %s684_s14 = sphi %s720_s14, %s21_s14   ;;  %s680_s13 = sphi %s718_s13, %s967_s13   ;;  %s676_s12 = sphi %s716_s12, %s966_s12   ;;  %s672_s11 = sphi %s714_s11, %s965_s11   ;;  %s668_s10 = sphi %s712_s10, %s964_s10   ;;  %s664_s9 = sphi %s710_s9, %s963_s9  }
   0x9   : > { %s40_s17 = sadd.s32 1, %s680_s13  ;;  %s49_s18 = sadd.s32 1, %s672_s11 }
   0xa   : > { %p42_p0 = scmp.ge.s32.totalorder %s40_s17, 2  ;;  %p56_p1 = scmp.ne.s32.totalorder %s672_s11, %s668_s10 }
   0xb   : > { %p57_p2 = scmp.eq.s32.totalorder %s684_s14, 0  ;;  %p62_p3 = scmp.ne.s32.totalorder %s668_s10, %s664_s9 }
   0xc   : > { %s969_s17 = smov (%p42_p0, %s40_s17), 0  ;;  %p63_p5 = scmp.eq.s32.totalorder %s430_s15, 0 }
   0xd   : > { %p751_p4 = por %p57_p2, %p56_p1  ;;  %s44_s20 = ssub.s32 %s680_s13, %s969_s17 }
   0xe   : > { %p118_p6 = scmp.eq.s32.totalorder %s430_s15, 1  ;;  %p47_p7 = scmp.eq.s32.totalorder %s44_s20, 0 }
   0xf   : > { %p757_p8 = por %p63_p5, %p62_p3  ;;  %p124_p10 = scmp.eq.s32.totalorder %s431_s16, 1 }
  0x10   : > { %p761_p9 = por %p118_p6, %p56_p1  ;;  %p480_p13 = scmp.lt.s32.totalorder %s684_s14, 2 }
  0x11   : > { %s953_s21 = scalar_select %p757_p8, 1, 0 }
  0x12   : > { %s954_s22 = scalar_select %p761_p9, 1, 0 }
  0x13   : > { %s766_s23 = scalar_select %p47_p7, %s672_s11, %s49_s18  }
  0x14   : > { %p768_p11 = por %p124_p10, %p62_p3  ;;  %s775_s25 = sand.u32 1, %s672_s11  }
  0x15   : > { %s434_s26 = sshll.u32 %s775_s25, 3  ;;  %s452_s27 = sshll.u32 %s680_s13, 7 }
  0x16   : > { %s955_s24 = scalar_select %p768_p11, 1, 0 }
  0x17   : > { %s784_s30 = scalar_lea.hbm %s947_s0, %s452_s27  ;;  %s148_s3 = scalar_lea.vmem [#allocation2], %s434_s26 }
  0x18   : > { %s157_s4 = sshll.u32 %s148_s3, 4  ;;  %p792_p0 = pnand %p480_p13, %p751_p4  ;;  %s788_s4 = int_to_ptr.vmem [resolvable:$true] %s157_s4 }
  0x19   : > { %s145_s6 = scalar_lea.sflag [#allocation3], %s775_s25  ;;  %s538_s7 = scalar_lea.hbm %s784_s30, 128 }
  0x1a   : > { %p539_p2 = scmp.ne.s32.totalorder %s784_s30, %s538_s7  ;;  %p540_p3 = pneg %p792_p0 }
  0x1b   : > { %s543_s16 = scalar_lea.hbm %s947_s0, 256  ;;  %p544_p4 = scmp.lt.u32.totalorder %s784_s30, %s947_s0 }
  0x1c   : > { %p541_p5 = pnand %p540_p3, %p539_p2  ;;  %p545_p7 = scmp.lt.u32.totalorder %s543_s16, %s538_s7 }
  0x1d   : > { %p547_p13 = scmp.lt.u32.totalorder %s538_s7, %s784_s30 }
  0x1e   : > { %p542_p6 = pneg %p541_p5  ;;  %p546_p10 = por %p545_p7, %p544_p4 }
  0x20   : > { %p548_p12 = por %p547_p13, %p546_p10 }
  0x22   : > { %p549_p1 = pnand %p548_p12, %p542_p6 }
  0x24   : > { %552 = shalt.err (!%p549_p1)
}
  0x25   : > { %s553_s20 = scalar_lea.vmem %s788_s4, 128  ;;  %s686_s28 = smov [#allocation2]  }
  0x26   : > { %p554_p2 = scmp.ne.s32.totalorder %s788_s4, %s553_s20  ;;  %s558_s29 = sshll.u32 %s686_s28, 4  ;;  %s559_s29 = int_to_ptr.vmem [resolvable:$false] %s558_s29 }
  0x27   : > { %s560_s3 = scalar_lea.vmem %s559_s29, 256  ;;  %p561_p9 = scmp.lt.s32.totalorder %s788_s4, %s559_s29 }
  0x28   : > { %p556_p5 = pnand %p554_p2, %p540_p3  ;;  %p562_p4 = scmp.lt.s32.totalorder %s560_s3, %s553_s20 }
  0x2a   : > { %p557_p11 = pneg %p556_p5  ;;  %p563_p7 = por %p562_p4, %p561_p9 }
  0x2c   : > { %p564_p10 = pnand %p563_p7, %p557_p11 }
  0x2e   : > { %567 = shalt.err (!%p564_p10)
}
  0x2f   : > { %s687_s7 = smov 64   ;;  %s688_s8 = smov 4  }
  0x30   : > { %472 = dma.hbm_to_vmem [thread:$0]  (!%p792_p0), %s784_s30, 128, %s788_s4, %s145_s6, %s687_s7, %s687_s7, %s688_s8  }
  0x31   : > { %p187_p9 = scmp.lt.s32.totalorder %s684_s14, 3  ;;  %s834_s18 = scalar_lea.hbm %s948_s1, %s452_s27 }
  0x32   : > { %p957_p11 = scmp.ge.s32.totalorder %s684_s14, 1  ;;  %s171_s20 = scalar_lea.vmem [#allocation5], %s434_s26 }
  0x33   : > { %s179_s28 = sshll.u32 %s171_s20, 4  ;;  %s168_s30 = scalar_lea.sflag [#allocation6], %s775_s25  ;;  %s844_s28 = int_to_ptr.vmem [resolvable:$true] %s179_s28 }
  0x34   : > { %p838_p12 = pnand %p957_p11, %p187_p9  ;;  %s568_s4 = scalar_lea.hbm %s834_s18, 128 }
  0x35   : > { %p569_p1 = scmp.ne.s32.totalorder %s834_s18, %s568_s4  ;;  %s573_s29 = scalar_lea.hbm %s948_s1, 256 }
  0x36   : > { %p574_p2 = scmp.lt.u32.totalorder %s834_s18, %s948_s1  ;;  %p575_p5 = scmp.lt.u32.totalorder %s573_s29, %s568_s4 }
  0x37   : > { %p571_p6 = pnand %p569_p1, %p540_p3  ;;  %p577_p7 = scmp.lt.u32.totalorder %s568_s4, %s834_s18 }
  0x38   : > { %p576_p4 = por %p575_p5, %p574_p2 }
  0x39   : > { %p572_p13 = pneg %p571_p6 }
  0x3a   : > { %p578_p10 = por %p577_p7, %p576_p4 }
  0x3c   : > { %p579_p9 = pnand %p578_p10, %p572_p13 }
  0x3e   : > { %582 = shalt.err (!%p579_p9)
}
  0x3f   : > { %s583_s26 = scalar_lea.vmem %s844_s28, 128  ;;  %s689_s16 = smov [#allocation5]  }
  0x40   : > { %p584_p11 = scmp.ne.s32.totalorder %s844_s28, %s583_s26  ;;  %s588_s20 = sshll.u32 %s689_s16, 4  ;;  %s589_s20 = int_to_ptr.vmem [resolvable:$false] %s588_s20 }
  0x41   : > { %s590_s27 = scalar_lea.vmem %s589_s20, 256  ;;  %p591_p8 = scmp.lt.s32.totalorder %s844_s28, %s589_s20 }
  0x42   : > { %p586_p1 = pnand %p584_p11, %p540_p3  ;;  %p592_p2 = scmp.lt.s32.totalorder %s590_s27, %s583_s26 }
  0x44   : > { %p587_p6 = pneg %p586_p1  ;;  %p593_p5 = por %p592_p2, %p591_p8 }
  0x46   : > { %p594_p4 = pnand %p593_p5, %p587_p6 }
  0x48   : > { %597 = shalt.err (!%p594_p4)
}
  0x49   : > { %475 = dma.hbm_to_vmem [thread:$0]  (!%p792_p0), %s834_s18, 128, %s844_s28, %s168_s30, %s687_s7, %s687_s7, %s688_s8  }
  0x4a   : > { %191 = sbr.rel (%p838_p12) target bundleno = 318 (0x13e), region = 28  ;;  %s878_s4 = sand.u32 (!%p838_p12), 1, %s668_s10  }
  0x4b   : > { %s441_s6 = sshll.u32 (!%p838_p12), %s878_s4, 3  ;;  %s194_s29 = scalar_lea.sflag (!%p838_p12), [#allocation3], %s878_s4 }
  0x4c   : > { %s197_s5 = scalar_lea.vmem (!%p838_p12), [#allocation2], %s441_s6  ;;  %p959_p8 = scmp.ne.s32.totalorder (!%p838_p12), %s953_s21, 0 }
  0x51   : > { %651 = dma.done.wait (%p959_p8), %s194_s29, 128  }
  0x52   : > { %653 = vsyncadd (%p959_p8), %s194_s29, 4294967168  ;;  %s203_s25 = scalar_lea.sflag [#allocation6], %s878_s4  ;;  %s206_s7 = scalar_lea.vmem [#allocation5], %s441_s6 }
  0x53   : > { %655 = dma.done.wait (%p959_p8), %s203_s25, 128  }
  0x54   : > { %657 = vsyncadd (%p959_p8), %s203_s25, 4294967168  ;;  %v690_v0 = vmov 0.0   ;;  %vm691_vm0 = vmmov 0   ;;  %v536_v1 = vld [vmem:[%s206_s7] sm:$0xff]   ;;  %v537_v2 = vld [vmem:[%s197_s5] sm:$0xff]   ;;  %vm250_vm1 = vcmask 130048  }
  0x55   : > { %457 = vmatprep.subr.bf16.mxu0 %v690_v0  ;;  %459 = vmatprep.mubr.msk.bf16.mxu0 %vm691_vm0, %v690_v0  ;;  %s443_s8 = sshll.u32 %s878_s4, 4  ;;  %s454_s28 = sshll.u32 %s676_s12, 8 }
  0x56   : > { %458 = vmatpush3.bf16.msra.mxu0 %v536_v1  ;;  %s231_s18 = scalar_lea.vmem [#allocation7], %s443_s8  ;;  %s898_s3 = scalar_lea.hbm %s949_s2, %s454_s28 }
  0x57   : > { %s314_s19 = sshll.u32 %s231_s18, 4  ;;  %s298_s15 = scalar_lea.sflag [#allocation4], %s878_s4  ;;  %s893_s19 = int_to_ptr.vmem [resolvable:$true] %s314_s19 }
  0x58   : > { %s598_s26 = scalar_lea.vmem %s893_s19, 256  ;;  %p960_p3 = scmp.ne.s32.totalorder %s954_s22, 0 }
  0x59   : > { %460 = vmatmul.mubr.msk.bf16.vlgmr.msra.gmra.mrb[0].mxu0 %vm250_vm1, %v537_v2  ;;  %p599_p0 = scmp.ne.s32.totalorder %s893_s19, %s598_s26  ;;  %s692_s12 = smov [#allocation7]  }
  0x5a   : > { %s602_s16 = sshll.u32 %s692_s12, 4  ;;  %s603_s16 = int_to_ptr.vmem [resolvable:$false] %s602_s16 }
  0x5b   : > { %p600_p12 = pnand %p599_p0, %p960_p3  ;;  %s604_s20 = scalar_lea.vmem %s603_s16, 512 }
  0x5c   : > { %p605_p7 = scmp.lt.s32.totalorder %s893_s19, %s603_s16  ;;  %p606_p10 = scmp.lt.s32.totalorder %s604_s20, %s598_s26 }
  0x5d   : > { %p601_p13 = pneg %p600_p12 }
  0x5e   : > { %p607_p9 = por %p606_p10, %p605_p7 }
  0x60   : > { %p608_p11 = pnand %p607_p9, %p601_p13 }
 0x12c   : > { %v288_v3 = vpop.f32.mrb[0].mxu0 }
 0x12d   : > { %295 = vst [vmem:[%s231_s18] sm:$0xff] %v288_v3  ;;  %v461_v4 = vpop.f32.mrb[1].mxu0 }
 0x12e   : > { %v291_v5 = vpop.f32.mrb[2].mxu0 }
 0x12f   : > { %296 = vst [vmem:[%s231_s18 + $0x8] sm:$0xff] %v291_v5  ;;  %v462_v6 = vpop.f32.mrb[3].mxu0 }
 0x130   : > { %611 = shalt.err (!%p608_p11)
}
 0x131   : > { %s612_s27 = scalar_lea.hbm %s898_s3, 256  ;;  %s616_s5 = scalar_lea.hbm %s949_s2, 512 }
 0x132   : > { %p613_p1 = scmp.ne.s32.totalorder %s898_s3, %s612_s27  ;;  %p617_p5 = scmp.lt.u32.totalorder %s898_s3, %s949_s2 }
 0x133   : > { %p618_p4 = scmp.lt.u32.totalorder %s616_s5, %s612_s27  ;;  %p620_p0 = scmp.lt.u32.totalorder %s612_s27, %s898_s3 }
 0x134   : > { %p614_p6 = pnand %p613_p1, %p960_p3 }
 0x135   : > { %p619_p8 = por %p618_p4, %p617_p5 }
 0x136   : > { %p615_p2 = pneg %p614_p6 }
 0x137   : > { %p621_p12 = por %p620_p0, %p619_p8 }
 0x139   : > { %p622_p13 = pnand %p621_p12, %p615_p2 }
 0x13b   : > { %625 = shalt.err (!%p622_p13)
}
 0x13c   : > { %s693_s8 = smov 128   ;;  %s694_s18 = smov 8  }
 0x13d   : > { %467 = dma.vmem_to_hbm [thread:$0]  (%p960_p3), %s893_s19, 256, %s898_s3, %s298_s15, %s693_s8, %s693_s8, %s694_s18  }
 0x13e PF: > { %s329_s28 = sand.u32 1, %s664_s9   ;;  %p961_p7 = scmp.ne.s32.totalorder %s955_s24, 0 }
 0x13f   : > { %p962_p10 = scmp.ge.s32.totalorder %s684_s14, 2  ;;  %s330_s21 = scalar_lea.sflag [#allocation4], %s329_s28 }
 0x141   : > { %p477_p9 = pnand %p962_p10, %p961_p7 }
 0x143   : > { %659 = dma.done.wait (!%p477_p9), %s330_s21, 256  }
 0x144   : > { %661 = vsyncadd (!%p477_p9), %s330_s21, 4294967040  ;;  %s21_s14 = sadd.s32 1, %s684_s14   ;;  %s963_s9 = smov %s668_s10 }
 0x145   : > { %p18_p11 = scmp.ge.s32.totalorder %s21_s14, 4   ;;  %s964_s10 = smov %s672_s11 }
 0x146   : > { %s965_s11 = smov %s766_s23  ;;  %s966_s12 = smov %s680_s13 }
 0x147   : > { %s967_s13 = smov %s969_s17  ;;  %20 = sbr.rel (!%p18_p11) target bundleno = 8 (0x8), region = 86 }
 0x14e   :  { %335 = vsyncpa [#allocation3], 1 }
 0x14f   :  { %337 = vsyncpa [#allocation3 + $0x1], 1 }
 0x150   :  { %338 = vsyncpa [#allocation6], 1 }
 0x151   :  { %340 = vsyncpa [#allocation6 + $0x1], 1 }
 0x152   :  { %341 = vsyncpa [#allocation4], 1 }
 0x153   :  { %343 = vsyncpa [#allocation4 + $0x1], 1 }

</bundles_post_ra>
